<compile_context>
chip_gen: v7x
topology: tpu7x:2x2x1
jax: 0.10.0
libtpu: 0.0.40
codegen_flags: <defaults>
</compile_context>

<pallas_src>
import jax
import jax.numpy as jnp
from jax import lax
from jax.experimental import pallas as pl
from jax.experimental.pallas import tpu as pltpu


def transition_kernel(x_ref, scale_ref, shift_ref, wt_ref, o_ref):
    """One grid step: `nb` images x `RT` pooled pixels.

    x_ref:     (nb, RT, 4*Cin)  window-grouped channels-last activations (bf16)
    scale_ref: (1, 4*Cin)       folded BN scale, tiled over the 4 window slots (f32)
    shift_ref: (1, 4*Cin)       folded BN shift, tiled over the 4 window slots (f32)
    wt_ref:    (Cout, 4*Cin)    0.25 * conv weight, tiled over the 4 window slots
    o_ref:     (nb, Cout, RT)   Cout-major output tile
    """
    scale = scale_ref[...]
    shift = shift_ref[...]
    wt = wt_ref[...]
    nb = x_ref.shape[0]
    for b in range(nb):  # nb is a small static constant -> unrolled at trace time
        # Widen the bf16 stream to f32 on the VPU; BN + ReLU stay in f32.
        a = jnp.maximum(x_ref[b].astype(jnp.float32) * scale + shift, 0.0)
        # Fused 1x1 conv + 2x2 avg pool: one MXU matmul contracting the last
        # dim of both operands (A @ B^T pattern), so the (Cout, RT) tile comes
        # straight out of the MXU -- no in-kernel transpose, f32 accumulation.
        y = lax.dot_general(
            wt, a.astype(wt.dtype),
            dimension_numbers=(((1,), (1,)), ((), ())),
            preferred_element_type=jnp.float32,
        )                                                     # (Cout, RT)
        o_ref[b] = y.astype(o_ref.dtype)


def _vmem_capacity_bytes():
    try:
        return int(pltpu.get_tpu_info().vmem_capacity_bytes)
    except Exception:
        return 64 << 20  # conservative (v7x-sized) fallback if the query fails


def _choose_tiling(N, P, C4, Cout, x_bytes, o_bytes, budget_bytes):
    """Pick (nb images per step, RT rows per step) within a VMEM budget."""
    # Double-buffered footprints (BlockSpec pipelining keeps 2 buffers/operand).
    const_bytes = 2 * (Cout * C4 * 2) + 2 * (2 * C4 * 4)      # weight + scale/shift
    per_row = 2 * (C4 * x_bytes) + 2 * (Cout * o_bytes)       # x tile + out tile
    rows_max = max(8, (budget_bytes - const_bytes) // per_row)

    rt, nb = P, 1
    if P > rows_max:
        # Spatial tiling: an RT < P must be a multiple of 128 (lane dim of the
        # output block) that divides P; otherwise keep the full row extent.
        t = (min(rows_max, P) // 128) * 128
        while t >= 128 and P % t:
            t -= 128
        if t >= 128:
            rt = t
    else:
        # Whole image fits: block several images per step to amortize per-step
        # overhead, but keep >= 2 grid steps when N > 1 so both v7x TensorCores
        # (and the megacore scheduler) have work.
        target_rows = min(rows_max, 2048)
        nb_cap = N if N == 1 else max(1, N // 2)
        for d in range(nb_cap, 0, -1):
            if N % d == 0 and d * P <= target_rows:
                nb = d
                break

    block_bytes = const_bytes + nb * rt * per_row
    return nb, rt, block_bytes


def transition_layer_pallas(x_nchw, gamma, beta, run_mean, run_var, conv_w,
                            eps=1e-5, use_bf16_matmul=True,
                            stream_dtype=jnp.bfloat16, out_dtype=None):
    """x_nchw: (N, Cin, H, W); conv_w: (Cout, Cin, 1, 1) -> (N, Cout, H//2, W//2).

    * stream_dtype: dtype of the activation stream fed to the kernel (bf16
      halves the dominant HBM read); BN+ReLU arithmetic is always f32 in-kernel.
    * use_bf16_matmul=True is the supported fast path (f32 MXU accumulation);
      keep it on, especially on v5e where the f32 matmul rate is far lower.
    * out_dtype: defaults to the input dtype; pass jnp.bfloat16 to also halve
      the (already small) write stream if the consumer accepts it.
    """
    N, Cin, H, W = x_nchw.shape
    Cout = conv_w.shape[0]
    assert H % 2 == 0 and W % 2 == 0, "AvgPool2d(2,2) path assumes even H, W"
    Hp, Wp = H // 2, W // 2
    P = Hp * Wp
    C4 = 4 * Cin
    out_dtype = x_nchw.dtype if out_dtype is None else out_dtype

    # ---- wrapper-side layout: group each 2x2 pool window into the channel dim.
    # (N,Cin,H,W) -> (N,Cin,Hp,2,Wp,2) -> (N,Hp,Wp,dy,dx,Cin) -> (N, P, 4*Cin)
    # The transpose is unavoidable given the NCHW contract, but it runs on the
    # narrow stream dtype, so it moves half the bytes it used to.
    # Window-slot ordering invariant: the C4 axis is (dy, dx) outer, Cin inner;
    # scale/shift/weight below are tiled with the same slot-major ordering.
    xs = x_nchw.astype(stream_dtype)
    xw = xs.reshape(N, Cin, Hp, 2, Wp, 2)
    xw = jnp.transpose(xw, (0, 2, 4, 3, 5, 1)).reshape(N, P, C4)

    # ---- fold BN into scale/shift; fold the 0.25 pool factor into the weight.
    inv_std = lax.rsqrt(run_var.astype(jnp.float32) + eps)
    scale1 = gamma.astype(jnp.float32) * inv_std                     # (Cin,)
    shift1 = beta.astype(jnp.float32) - run_mean.astype(jnp.float32) * scale1
    scale = jnp.tile(scale1, 4).reshape(1, C4)                       # slot-major
    shift = jnp.tile(shift1, 4).reshape(1, C4)
    mm_dtype = jnp.bfloat16 if use_bf16_matmul else jnp.float32
    w1 = conv_w[:, :, 0, 0].astype(jnp.float32)                      # (Cout, Cin)
    wt = jnp.tile(0.25 * w1, (1, 4)).astype(mm_dtype)                # (Cout, 4*Cin)

    # ---- tiling & VMEM budget (generation aware: 64 MiB/TC v7x, 128 MiB else).
    cap = _vmem_capacity_bytes()
    budget = int(cap * 0.6)          # headroom for compiler scratch / semaphores
    x_bytes = jnp.dtype(stream_dtype).itemsize
    o_bytes = jnp.dtype(out_dtype).itemsize
    nb, RT, block_bytes = _choose_tiling(N, P, C4, Cout, x_bytes, o_bytes, budget)
    grid = (N // nb, P // RT)
    vmem_limit = int(min(cap - (4 << 20), max(32 << 20, block_bytes + (8 << 20))))

    out_flat = pl.pallas_call(
        transition_kernel,
        out_shape=jax.ShapeDtypeStruct((N, Cout, P), out_dtype),
        grid_spec=pltpu.PrefetchScalarGridSpec(
            num_scalar_prefetch=0,
            grid=grid,
            in_specs=[
                pl.BlockSpec((nb, RT, C4), lambda n, r: (n, r, 0)),
                pl.BlockSpec((1, C4), lambda n, r: (0, 0)),
                pl.BlockSpec((1, C4), lambda n, r: (0, 0)),
                pl.BlockSpec((Cout, C4), lambda n, r: (0, 0)),
            ],
            out_specs=pl.BlockSpec((nb, Cout, RT), lambda n, r: (n, 0, r)),
        ),
        # (allow_input_fusion=[0] can additionally let XLA fuse the wrapper-side
        #  bf16 transpose into the operand read; left off for portability.)
        compiler_params=pltpu.CompilerParams(
            dimension_semantics=("parallel", "parallel"),
            vmem_limit_bytes=vmem_limit,
        ),
    )(xw, scale, shift, wt)

    # (N, Cout, P) -> (N, Cout, Hp, Wp): pure reshape, no output transpose.
    return out_flat.reshape(N, Cout, Hp, Wp)


def transition_layer_ref(x_nchw, gamma, beta, run_mean, run_var, conv_w, eps=1e-5):
    """Pure-JAX reference mirroring the PyTorch module (inference-mode BN)."""
    xn = (x_nchw - run_mean[None, :, None, None]) / jnp.sqrt(
        run_var[None, :, None, None] + eps
    )
    xn = xn * gamma[None, :, None, None] + beta[None, :, None, None]
    xn = jnp.maximum(xn, 0.0)
    y = jnp.einsum("nchw,oc->nohw", xn, conv_w[:, :, 0, 0])
    n, co, h, w = y.shape
    return y.reshape(n, co, h // 2, 2, w // 2, 2).mean(axis=(3, 5))


if __name__ == "__main__":
    key = jax.random.PRNGKey(0)
    N, Cin, H, W = 2, 4, 16, 16
    Cout = 8

    k1, k2, k3, k4, k5, k6 = jax.random.split(key, 6)
    x = jax.random.normal(k1, (N, Cin, H, W), jnp.float32)
    gamma = 1.0 + 0.1 * jax.random.normal(k2, (Cin,), jnp.float32)
    beta = 0.1 * jax.random.normal(k3, (Cin,), jnp.float32)
    run_mean = 0.1 * jax.random.normal(k4, (Cin,), jnp.float32)
    run_var = jnp.abs(jax.random.normal(k5, (Cin,), jnp.float32)) + 0.5
    conv_w = 0.1 * jax.random.normal(k6, (Cout, Cin, 1, 1), jnp.float32)

    out = transition_layer_pallas(x, gamma, beta, run_mean, run_var, conv_w)
    out = jax.block_until_ready(out)

    ref = transition_layer_ref(x, gamma, beta, run_mean, run_var, conv_w)
    assert out.shape == (N, Cout, H // 2, W // 2), out.shape
    # bf16 activation/weight stream (f32 BN + f32 MXU accumulation) -> loose tol
    err = float(jnp.max(jnp.abs(out - ref)))
    assert jnp.allclose(out, ref, atol=2e-2, rtol=2e-2), err
    print("KERNEL_OK")
</pallas_src>

<mosaic_0001>
module attributes {stable_mosaic.version = 11 : i64} {
  func.func @transition_kernel(%arg0: i32, %arg1: i32, %arg2: memref<1x64x16xbf16, #tpu.memory_space<vmem>>, %arg3: memref<1x16xf32, #tpu.memory_space<vmem>>, %arg4: memref<1x16xf32, #tpu.memory_space<vmem>>, %arg5: memref<8x16xbf16, #tpu.memory_space<vmem>>, %arg6: memref<1x8x64xf32, #tpu.memory_space<vmem>>) attributes {dimension_semantics = [#tpu.dimension_semantics<parallel>, #tpu.dimension_semantics<parallel>], iteration_bounds = array<i64: 2, 1>, scalar_prefetch = 0 : i64, scratch_operands = 0 : i64, tpu.core_type = #tpu.core_type<tc>, window_params = [{transform_indices = @transform_0, window_bounds = array<i64: 1, 64, 16>}, {pipeline_mode = #tpu.pipeline_mode<synchronous>, transform_indices = @transform_1, window_bounds = array<i64: 1, 16>}, {pipeline_mode = #tpu.pipeline_mode<synchronous>, transform_indices = @transform_2, window_bounds = array<i64: 1, 16>}, {pipeline_mode = #tpu.pipeline_mode<synchronous>, transform_indices = @transform_3, window_bounds = array<i64: 8, 16>}, {transform_indices = @transform_4, window_bounds = array<i64: 1, 8, 64>}]} {
    %c0 = arith.constant 0 : index
    %c0_0 = arith.constant 0 : index
    %0 = vector.load %arg3[%c0, %c0_0] : memref<1x16xf32, #tpu.memory_space<vmem>>, vector<1x16xf32>
    %c0_1 = arith.constant 0 : index
    %c0_2 = arith.constant 0 : index
    %1 = vector.load %arg4[%c0_1, %c0_2] : memref<1x16xf32, #tpu.memory_space<vmem>>, vector<1x16xf32>
    %c0_3 = arith.constant 0 : index
    %c0_4 = arith.constant 0 : index
    %2 = vector.load %arg5[%c0_3, %c0_4] : memref<8x16xbf16, #tpu.memory_space<vmem>>, vector<8x16xbf16>
    %c0_5 = arith.constant 0 : index
    %c0_6 = arith.constant 0 : index
    %c0_7 = arith.constant 0 : index
    %3 = vector.load %arg2[%c0_5, %c0_6, %c0_7] : memref<1x64x16xbf16, #tpu.memory_space<vmem>>, vector<1x64x16xbf16>
    %4 = vector.shape_cast %3 : vector<1x64x16xbf16> to vector<64x16xbf16>
    %5 = arith.extf %4 : vector<64x16xbf16> to vector<64x16xf32>
    %6 = vector.broadcast %0 : vector<1x16xf32> to vector<64x16xf32>
    %7 = arith.mulf %5, %6 : vector<64x16xf32>
    %8 = vector.broadcast %1 : vector<1x16xf32> to vector<64x16xf32>
    %9 = arith.addf %7, %8 : vector<64x16xf32>
    %cst = arith.constant 0.000000e+00 : f32
    %10 = vector.broadcast %cst : f32 to vector<64x16xf32>
    %11 = arith.maximumf %9, %10 : vector<64x16xf32>
    %12 = arith.truncf %11 : vector<64x16xf32> to vector<64x16xbf16>
    %cst_8 = arith.constant dense<0.000000e+00> : vector<8x64xf32>
    %13 = tpu.matmul %2, %12, %cst_8 {dimension_numbers = #tpu.dot_dimension_numbers<[1], [1], [0], [0], [0, 0, 1, 0], [], []>} : vector<8x16xbf16>, vector<64x16xbf16>, vector<8x64xf32> -> vector<8x64xf32>
    %c0_9 = arith.constant 0 : index
    %c0_10 = arith.constant 0 : index
    %c0_11 = arith.constant 0 : index
    %14 = vector.load %arg6[%c0_9, %c0_10, %c0_11] : memref<1x8x64xf32, #tpu.memory_space<vmem>>, vector<1x8x64xf32>
    %15 = vector.shape_cast %14 : vector<1x8x64xf32> to vector<8x64xf32>
    %16 = vector.shape_cast %13 : vector<8x64xf32> to vector<1x8x64xf32>
    tpu.vector_store %arg6[%c0_9, %c0_10, %c0_11], %16 {strides = array<i32>} : memref<1x8x64xf32, #tpu.memory_space<vmem>>, vector<1x8x64xf32>,
    return
  }
  func.func @transform_0(%arg0: i32, %arg1: i32) -> (i32, i32, i32) {
    %c0_i32 = arith.constant 0 : i32
    %c0_i32_0 = arith.constant 0 : i32
    return %arg0, %arg1, %c0_i32 : i32, i32, i32
  }
  func.func @transform_1(%arg0: i32, %arg1: i32) -> (i32, i32) {
    %c0_i32 = arith.constant 0 : i32
    %c0_i32_0 = arith.constant 0 : i32
    %c0_i32_1 = arith.constant 0 : i32
    return %c0_i32, %c0_i32_0 : i32, i32
  }
  func.func @transform_2(%arg0: i32, %arg1: i32) -> (i32, i32) {
    %c0_i32 = arith.constant 0 : i32
    %c0_i32_0 = arith.constant 0 : i32
    %c0_i32_1 = arith.constant 0 : i32
    return %c0_i32, %c0_i32_0 : i32, i32
  }
  func.func @transform_3(%arg0: i32, %arg1: i32) -> (i32, i32) {
    %c0_i32 = arith.constant 0 : i32
    %c0_i32_0 = arith.constant 0 : i32
    %c0_i32_1 = arith.constant 0 : i32
    return %c0_i32, %c0_i32_0 : i32, i32
  }
  func.func @transform_4(%arg0: i32, %arg1: i32) -> (i32, i32, i32) {
    %c0_i32 = arith.constant 0 : i32
    %c0_i32_0 = arith.constant 0 : i32
    return %arg0, %c0_i32, %arg1 : i32, i32, i32
  }
}

</mosaic_0001>

<bundles_post_ra>
// kernel: tpu_custom_call.1
= control target key start
LH: loop header
LB: loop body
LE: loop exit
PB: predicated region body
PF: predicated region fallthrough
CT: control target
= control target key end

     0   :  { %9 = vsyncpa [#allocation3], 0  ;;  %s776_s0 = inlined_call_operand.vmem [shape: bf16[2,64,16], index: 0, kind: input, shape index: {}]   ;;  %s777_s1 = inlined_call_operand.vmem [shape: f32[1,16], index: 1, kind: input, shape index: {}]   ;;  %s778_s2 = inlined_call_operand.vmem [shape: f32[1,16], index: 2, kind: input, shape index: {}]   ;;  %s779_s3 = inlined_call_operand.vmem [shape: bf16[8,16], index: 3, kind: input, shape index: {}]   ;;  %s780_s4 = inlined_call_operand.hbm [shape: f32[2,8,64], index: 4, kind: output, shape index: {}]  }
   0x1   :  { %11 = vsyncpa [#allocation3 + $0x1], 0  ;;  %s650_s15 = smov 0   ;;  %s652_s16 = smov 0  }
   0x2   :  { %s654_s17 = smov 0   ;;  %s656_s18 = smov 0  }
   0x3   :  { %s658_s19 = smov 0   ;;  %s660_s20 = smov 0  }
   0x4 LB: > { %s433_s21 = sadd.s32 4294967295, %s620_s20   ;;  %s434_s22 = sadd.s32 4294967294, %s620_s20   ;;  %s620_s20 = sphi %s660_s20, %s17_s20   ;;  %s616_s19 = sphi %s658_s19, %s787_s19   ;;  %s612_s18 = sphi %s656_s18, %s786_s18   ;;  %s608_s17 = sphi %s654_s17, %s785_s17   ;;  %s604_s16 = sphi %s652_s16, %s784_s16   ;;  %s600_s15 = sphi %s650_s15, %s783_s15  }
   0x5   : > { %s29_s23 = sadd.s32 1, %s616_s19  ;;  %s129_s24 = sadd.s32 1, %s608_s17 }
   0x6   : > { %p31_p0 = scmp.ge.s32.totalorder %s29_s23, 2  ;;  %p139_p1 = scmp.ne.s32.totalorder %s608_s17, %s604_s16 }
   0x7   : > { %p140_p2 = scmp.eq.s32.totalorder %s433_s21, 1  ;;  %p145_p3 = scmp.ne.s32.totalorder %s604_s16, %s600_s15 }
   0x8   : > { %s789_s23 = smov (%p31_p0, %s29_s23), 0  ;;  %p146_p5 = scmp.eq.s32.totalorder %s434_s22, 1 }
   0x9   : > { %p690_p4 = por %p140_p2, %p139_p1  ;;  %s124_s26 = ssub.s32 %s616_s19, %s789_s23 }
   0xa   : > { %p437_p6 = scmp.ge.s32.totalorder %s620_s20, 1  ;;  %p127_p7 = scmp.eq.s32.totalorder %s124_s26, 0 }
   0xb   : > { %p697_p8 = por %p146_p5, %p145_p3  ;;  %p186_p9 = scmp.lt.s32.totalorder %s620_s20, 3 }
   0xc   : > { %s703_s28 = scalar_select %p127_p7, %s608_s17, %s129_s24  }
   0xd   : > { %p187_p10 = pnand %p437_p6, %p186_p9 }
   0xe   : > { %p217_p11 = scmp.lt.s32.totalorder (!%p187_p10), %s612_s18, 1  ;;  %v622_v0 = vmov (!%p187_p10), 0.0   ;;  %vm623_vm0 = vmmov (!%p187_p10), 0   ;;  %v441_v1 = vld [vmem:[%s777_s1] ss:$0 sm:$0xff] (!%p187_p10)  ;;  %vm286_vm1 = vcmask (!%p187_p10), 130048  }
   0xf   : > { %190 = sbr.rel (%p187_p10) target bundleno = 296 (0x128), region = 36  ;;  %473 = vmatprep.subr.bf16.mxu0 (!%p187_p10), %v622_v0  ;;  %481 = vmatprep.mubr.msk.bf16.mxu0 (!%p187_p10), %vm623_vm0, %v622_v0  ;;  %v442_v9 = vld [vmem:[%s778_s2] ss:$0 sm:$0xff] (!%p187_p10)  ;;  %s213_s14 = sand.u32 (!%p187_p10), 1, %s604_s16   ;;  %vm342_vm2 = vcmask (!%p187_p10), 523264  }
  0x10   : > { %v229_v47 = vld [vmem:[%s779_s3] sm:$0xf] (!%p187_p10)  ;;  %s438_s21 = sshll.u32 (!%p187_p10), %s213_s14, 3  ;;  %s445_s22 = sshll.u32 (!%p187_p10), %s612_s18, 7 }
  0x11   : > { %s215_s24 = scalar_lea.vmem (!%p187_p10), [#allocation2], %s438_s21  ;;  %s729_s5 = scalar_lea.hbm (!%p187_p10), %s780_s4, %s445_s22 }
  0x12   : > { %s359_s26 = sshll.u32 (!%p187_p10), %s215_s24, 4  ;;  %s345_s6 = scalar_lea.sflag (!%p187_p10), [#allocation3], %s213_s14  ;;  %s731_s26 = int_to_ptr.vmem [resolvable:$true] %s359_s26 }
  0x16   : > { %s218_s29 = scalar_select %p217_p11, %s612_s18, 1 }
  0x17   : > { %s624_s18 = smov [#allocation2]  }
  0x18   : > { %s448_s30 = sshll.u32 %s218_s29, 5  ;;  %s546_s8 = sshll.u32 %s624_s18, 4  ;;  %s547_s8 = int_to_ptr.vmem [resolvable:$false] %s546_s8 }
  0x19   : > { %s224_s7 = scalar_lea.vmem %s776_s0, %s448_s30  ;;  %s548_s9 = scalar_lea.vmem %s547_s8, 256 }
  0x1a   : > { %v450_v2 = vld [vmem:[%s224_s7] sm:$0xff]   ;;  %v465_v3 = vld [vmem:[%s224_s7 + $0x8] sm:$0xff]   ;;  %v466_v8 = vld [vmem:[%s224_s7 + $0x10] sm:$0xff]   ;;  %p549_p1 = scmp.lt.s32.totalorder %s731_s26, %s547_s8 }
  0x1b   : > { %v451_v4 = vunpack.c.l.bf16 %v450_v2  ;;  %v452_v5 = vunpack.c.h.bf16 %v450_v2  ;;  %v455_v6 = vunpack.c.l.bf16 %v465_v3  ;;  %v456_v7 = vunpack.c.h.bf16 %v465_v3  ;;  %v467_v27 = vld [vmem:[%s224_s7 + $0x18] sm:$0xff]   ;;  %s542_s7 = scalar_lea.vmem %s731_s26, 128 }
  0x1c   : > { %v459_v14 = vunpack.c.l.bf16 %v466_v8  ;;  %v460_v15 = vunpack.c.h.bf16 %v466_v8  ;;  %v463_v29 = vunpack.c.l.bf16 %v467_v27  ;;  %v464_v33 = vunpack.c.h.bf16 %v467_v27  ;;  %p543_p12 = scmp.ne.s32.totalorder %s731_s26, %s542_s7  ;;  %p550_p2 = scmp.lt.s32.totalorder %s548_s9, %s542_s7 }
  0x1d   : > { %v252_v10 = vmul.f32 %v451_v4, %v441_v1  ;;  %v253_v11 = vmul.f32 %v452_v5, %v441_v1  ;;  %v254_v12 = vmul.f32 %v455_v6, %v441_v1  ;;  %v255_v13 = vmul.f32 %v456_v7, %v441_v1 }
  0x1e   : > { %v256_v22 = vmul.f32 %v459_v14, %v441_v1  ;;  %v257_v26 = vmul.f32 %v460_v15, %v441_v1  ;;  %v258_v34 = vmul.f32 %v463_v29, %v441_v1  ;;  %v259_v38 = vmul.f32 %v464_v33, %v441_v1  ;;  %p544_p13 = pnand %p543_p12, %p690_p4  ;;  %p551_p3 = por %p550_p2, %p549_p1 }
  0x1f   : > { %v266_v16 = vadd.f32 %v442_v9, %v252_v10  ;;  %v267_v17 = vadd.f32 %v442_v9, %v253_v11  ;;  %v268_v18 = vadd.f32 %v442_v9, %v254_v12  ;;  %v269_v19 = vadd.f32 %v442_v9, %v255_v13 }
  0x20   : > { %v270_v31 = vadd.f32 %v442_v9, %v256_v22  ;;  %v271_v32 = vadd.f32 %v442_v9, %v257_v26  ;;  %v272_v40 = vadd.f32 %v442_v9, %v258_v34  ;;  %v273_v41 = vadd.f32 %v442_v9, %v259_v38  ;;  %p545_p0 = pneg %p544_p13 }
  0x21   : > { %v274_v20 = vmax.f32 %v266_v16, 0.0  ;;  %v275_v21 = vmax.f32 %v267_v17, 0.0  ;;  %v276_v24 = vmax.f32 %v268_v18, 0.0  ;;  %v277_v25 = vmax.f32 %v269_v19, 0.0 }
  0x22   : > { %v278_v36 = vmax.f32 %v270_v31, 0.0  ;;  %v279_v37 = vmax.f32 %v271_v32, 0.0  ;;  %v280_v43 = vmax.f32 %v272_v40, 0.0  ;;  %v281_v44 = vmax.f32 %v273_v41, 0.0  ;;  %p552_p5 = pnand %p551_p3, %p545_p0 }
  0x23   : > { %v282_v23 = vpack.c.bf16 %v275_v21, %v274_v20  ;;  %v283_v30 = vpack.c.bf16 %v277_v25, %v276_v24 }
  0x24   : > { %v284_v39 = vpack.c.bf16 %v279_v37, %v278_v36  ;;  %v285_v45 = vpack.c.bf16 %v281_v44, %v280_v43 }
  0x25   : > { %v291_v28 = vsel %vm286_vm1, %v282_v23, 0  ;;  %v294_v35 = vsel %vm286_vm1, %v283_v30, 0 }
  0x26   : > { %474 = vmatpush3.bf16.xpose.msra.mxu0 %v291_v28  ;;  %v297_v42 = vsel %vm286_vm1, %v284_v39, 0  ;;  %v300_v46 = vsel %vm286_vm1, %v285_v45, 0 }
  0x27   : > { %475 = vmatprep.subr.bf16.mxu0 %v622_v0 }
  0x2e   : > { %476 = vmatpush3.bf16.xpose.msra.mxu0 %v294_v35 }
  0x2f   : > { %477 = vmatprep.subr.bf16.mxu0 %v622_v0 }
  0x36   : > { %478 = vmatpush3.bf16.xpose.msra.mxu0 %v297_v42 }
  0x37   : > { %479 = vmatprep.subr.bf16.mxu0 %v622_v0 }
  0x3e   : > { %480 = vmatpush3.bf16.xpose.msra.mxu0 %v300_v46 }
  0x45   : > { %482 = vmatmul.mubr.msk.bf16.vlgmr.msra.gmra.mrb[0].mxu0 %vm286_vm1, %v229_v47 }
 0x118   : > { %v336_v48 = vpop.f32.mrb[0].mxu0 }
 0x119   : > { %343 = vst.msk [vmem:[%s215_s24] sm:$0xff] %vm342_vm2, %v336_v48  ;;  %v483_v49 = vpop.f32.mrb[1].mxu0 }
 0x11a   : > { %v339_v50 = vpop.f32.mrb[2].mxu0 }
 0x11b   : > { %555 = shalt.err (!%p552_p5)
}
 0x11c   : > { %s556_s10 = scalar_lea.hbm %s729_s5, 128  ;;  %s560_s13 = scalar_lea.hbm %s780_s4, 256 }
 0x11d   : > { %p557_p6 = scmp.ne.s32.totalorder %s729_s5, %s556_s10  ;;  %p561_p10 = scmp.lt.u32.totalorder %s729_s5, %s780_s4 }
 0x11e   : > { %p562_p11 = scmp.lt.u32.totalorder %s560_s13, %s556_s10  ;;  %p564_p13 = scmp.lt.u32.totalorder %s556_s10, %s729_s5 }
 0x11f   : > { %p558_p7 = pnand %p557_p6, %p690_p4 }
 0x120   : > { %p563_p12 = por %p562_p11, %p561_p10 }
 0x121   : > { %p559_p9 = pneg %p558_p7 }
 0x122   : > { %p565_p0 = por %p564_p13, %p563_p12 }
 0x124   : > { %p566_p1 = pnand %p565_p0, %p559_p9 }
 0x126   : > { %569 = shalt.err (!%p566_p1)
}
 0x127   : > { %485 = dma.vmem_to_hbm [thread:$0]  (%p690_p4), %s731_s26, 128, %s729_s5, %s345_s6   ;;  %v484_v51 = vpop.f32.mrb[3].mxu0 }
 0x128 PF: > { %p491_p2 = scmp.ge.s32.totalorder %s620_s20, 2  ;;  %s371_s22 = sand.u32 1, %s600_s15  }
 0x129   : > { %s372_s24 = scalar_lea.sflag [#allocation3], %s371_s22 }
 0x12a   : > { %p488_p3 = pnand %p491_p2, %p697_p8 }
 0x12c   : > { %595 = dma.done.wait (!%p488_p3), %s372_s24, 128  }
 0x12d   : > { %597 = vsyncadd (!%p488_p3), %s372_s24, 4294967168  ;;  %s17_s20 = sadd.s32 1, %s620_s20   ;;  %s783_s15 = smov %s604_s16 }
 0x12e   : > { %p14_p5 = scmp.ge.s32.totalorder %s17_s20, 4   ;;  %s784_s16 = smov %s608_s17 }
 0x12f   : > { %s785_s17 = smov %s703_s28  ;;  %s786_s18 = smov %s616_s19 }
 0x130   : > { %s787_s19 = smov %s789_s23  ;;  %16 = sbr.rel (!%p14_p5) target bundleno = 4 (0x4), region = 71 }
 0x137   :  { %377 = vsyncpa [#allocation3], 1 }
 0x138   :  { %379 = vsyncpa [#allocation3 + $0x1], 1 }

</bundles_post_ra>
